<compile_context>
chip_gen: v7x
topology: tpu7x:2x2x1
jax: 0.10.0
libtpu: 0.0.40
codegen_flags: <defaults>
</compile_context>

<pallas_src>
import functools

import jax
import jax.numpy as jnp
from jax.experimental import pallas as pl
from jax.experimental.pallas import tpu as pltpu


# ----------------------------- tiling helpers ------------------------------

@functools.lru_cache(maxsize=None)
def _vmem_limit():
    """Generation-aware scoped-VMEM budget: ~75% of physical, capped."""
    cap = 64 << 20
    try:
        info = pltpu.get_tpu_info()
        cap = int(getattr(info, "vmem_capacity_bytes", cap))
    except Exception:
        pass
    return int(min((cap * 3) // 4, 110 << 20))


def _default_row_target():
    # Bigger tiles on 128-MiB parts (v5e/v6e), smaller on v7x (64 MiB).
    return 512 if _vmem_limit() > (64 << 20) else 256


def _row_tile(m, target):
    """Row tile: multiple of 8, capped at `target`, never larger than needed."""
    target = max(8, (target // 8) * 8)
    if m >= target:
        return target
    return max(8, ((m + 7) // 8) * 8)


def _col_tile(n, target=1024):
    """Lane tile: either the full dim or a multiple of 128 that divides n."""
    if n <= target or n % 128 != 0:
        return n
    t = (target // 128) * 128
    while n % t != 0:
        t -= 128
    return max(t, 128)


# -------------------------------- kernels ----------------------------------

def _matmul_bias_kernel(x_ref, w_ref, b_ref, o_ref, *, activation):
    w = w_ref[...]
    x = x_ref[...].astype(w.dtype)              # MXU operands in weight dtype
    acc = jnp.dot(x, w, preferred_element_type=jnp.float32)
    acc = acc + b_ref[...].astype(jnp.float32)
    if activation == "gelu":
        acc = jax.nn.gelu(acc, approximate=False)   # exact erf GELU (torch default)
    o_ref[...] = acc.astype(o_ref.dtype)


def _matmul_bias_res_ln_kernel(x_ref, w_ref, b_ref, res_ref, g_ref, be_ref,
                               o_ref, acc_ref, *, eps):
    """K-tiled  LayerNorm(res + x @ W + b) * gamma + beta  with f32 accumulator."""
    @pl.when(pl.program_id(1) == 0)
    def _():
        acc_ref[...] = jnp.zeros_like(acc_ref)

    w = w_ref[...]
    x = x_ref[...].astype(w.dtype)
    acc_ref[...] += jnp.dot(x, w, preferred_element_type=jnp.float32)

    @pl.when(pl.program_id(1) == pl.num_programs(1) - 1)
    def _():
        acc = (acc_ref[...] + b_ref[...].astype(jnp.float32)
               + res_ref[...].astype(jnp.float32))
        # LayerNorm over the last dim (biased variance, eps inside rsqrt == torch)
        mean = jnp.mean(acc, axis=-1, keepdims=True)
        var = jnp.mean((acc - mean) * (acc - mean), axis=-1, keepdims=True)
        y = (acc - mean) * jax.lax.rsqrt(var + eps)
        y = y * g_ref[...].astype(jnp.float32) + be_ref[...].astype(jnp.float32)
        o_ref[...] = y.astype(o_ref.dtype)


def _attention_kernel(qkv_ref, o_ref, *, nhead, scale):
    """One batch element per grid step; all heads computed together.

    qkv_ref: (1, S, 3E) laid out as [Q | K | V], each E = nhead * Dh.
    o_ref:   (1, S, E)  lane-dense output (no post-kernel relayout needed).
    """
    E = o_ref.shape[2]
    Dh = E // nhead
    qkv = qkv_ref[0]                                   # (S, 3E), stored dtype
    heads = []
    for h in range(nhead):                             # unrolled over heads
        q = qkv[:, h * Dh:(h + 1) * Dh]
        k = qkv[:, E + h * Dh:E + (h + 1) * Dh]
        v = qkv[:, 2 * E + h * Dh:2 * E + (h + 1) * Dh]
        # scores: (S, S); MXU operands stay in stored dtype, f32 accumulate.
        s = jax.lax.dot_general(q, k, (((1,), (1,)), ((), ())),
                                preferred_element_type=jnp.float32) * scale
        s = s - jnp.max(s, axis=-1, keepdims=True)
        p = jnp.exp(s)
        inv = pl.reciprocal(jnp.sum(p, axis=-1, keepdims=True), approx=True)
        p = p * inv
        heads.append(jnp.dot(p.astype(v.dtype), v,
                             preferred_element_type=jnp.float32))
    o_ref[0] = jnp.concatenate(heads, axis=-1).astype(o_ref.dtype)


# --------------------------- pallas_call wrappers ---------------------------

def _linear(x, w, b, *, activation=None, tm=None, tn_target=1024):
    """y = act(x @ w + b); weight-column axis outermost so each (K,tn) weight
    tile is fetched once and revisited across the row loop."""
    M, K = x.shape
    _, N = w.shape
    tm = _row_tile(M, tm if tm is not None else _default_row_target())
    tn = _col_tile(N, tn_target)

    kernel = functools.partial(_matmul_bias_kernel, activation=activation)
    return pl.pallas_call(
        kernel,
        out_shape=jax.ShapeDtypeStruct((M, N), x.dtype),
        grid_spec=pltpu.PrefetchScalarGridSpec(
            num_scalar_prefetch=0,
            grid=(pl.cdiv(N, tn), pl.cdiv(M, tm)),     # (j over N, i over M)
            in_specs=[
                pl.BlockSpec((tm, K), lambda j, i: (i, 0)),   # activations
                pl.BlockSpec((K, tn), lambda j, i: (0, j)),   # weight (revisited over i)
                pl.BlockSpec((1, tn), lambda j, i: (0, j)),   # bias
            ],
            out_specs=pl.BlockSpec((tm, tn), lambda j, i: (i, j)),
        ),
        compiler_params=pltpu.CompilerParams(
            dimension_semantics=("parallel", "parallel"),
            vmem_limit_bytes=_vmem_limit()),
    )(x, w, b)


def _linear_res_ln(x, w, b, res, gamma, beta, *, tm=None, tk_target=512, eps=1e-5):
    """y = LayerNorm(res + x @ w + b) * gamma + beta; K-tiled reduction with an
    f32 accumulator scratch (keeps v7x VMEM headroom)."""
    M, K = x.shape
    _, N = w.shape
    tm = _row_tile(M, tm if tm is not None else _default_row_target())
    tk = _col_tile(K, tk_target)                      # divisor of K (or full K)

    kernel = functools.partial(_matmul_bias_res_ln_kernel, eps=eps)
    return pl.pallas_call(
        kernel,
        out_shape=jax.ShapeDtypeStruct((M, N), x.dtype),
        grid_spec=pltpu.PrefetchScalarGridSpec(
            num_scalar_prefetch=0,
            grid=(pl.cdiv(M, tm), K // tk),
            in_specs=[
                pl.BlockSpec((tm, tk), lambda i, k: (i, k)),  # x tile
                pl.BlockSpec((tk, N), lambda i, k: (k, 0)),   # weight K-tile
                pl.BlockSpec((1, N), lambda i, k: (0, 0)),    # bias
                pl.BlockSpec((tm, N), lambda i, k: (i, 0)),   # residual
                pl.BlockSpec((1, N), lambda i, k: (0, 0)),    # LN gamma
                pl.BlockSpec((1, N), lambda i, k: (0, 0)),    # LN beta
            ],
            out_specs=pl.BlockSpec((tm, N), lambda i, k: (i, 0)),
            scratch_shapes=[pltpu.VMEM((tm, N), jnp.float32)],
        ),
        compiler_params=pltpu.CompilerParams(
            dimension_semantics=("parallel", "arbitrary"),
            vmem_limit_bytes=_vmem_limit()),
    )(x, w, b, res, gamma, beta)


def _attention(qkv, *, nhead):
    """qkv: (B, S, 3E) -> (B, S, E); one batch element (all heads) per step."""
    B, S, E3 = qkv.shape
    E = E3 // 3
    Dh = E // nhead
    scale = 1.0 / float(Dh) ** 0.5
    return pl.pallas_call(
        functools.partial(_attention_kernel, nhead=nhead, scale=scale),
        out_shape=jax.ShapeDtypeStruct((B, S, E), qkv.dtype),
        grid_spec=pltpu.PrefetchScalarGridSpec(
            num_scalar_prefetch=0,
            grid=(B,),
            in_specs=[pl.BlockSpec((1, S, E3), lambda b: (b, 0, 0))],
            out_specs=pl.BlockSpec((1, S, E), lambda b: (b, 0, 0)),
        ),
        compiler_params=pltpu.CompilerParams(
            dimension_semantics=("parallel",),
            vmem_limit_bytes=_vmem_limit()),
    )(qkv)


# ------------------------------ encoder layers ------------------------------

def _encoder_layer(x2d, p, *, nhead, S, B, tm, eps=1e-5):
    """x2d: (B*S, E) row-major over (batch, seq); returns the same layout."""
    E = x2d.shape[-1]

    # 1) fused Q/K/V projection -> (B*S, 3E)
    qkv = _linear(x2d, p["wqkv"], p["bqkv"], tm=tm)

    # 2) attention; (B, S, 3E) is a pure view of the projection output and the
    #    (B, S, E) result reshapes straight into the out-proj (no relayouts).
    a2d = _attention(qkv.reshape(B, S, 3 * E), nhead=nhead).reshape(B * S, E)

    # 3) out-proj + residual + LayerNorm1 (dropout1 = identity in eval)
    h = _linear_res_ln(a2d, p["wo"], p["bo"], x2d, p["g1"], p["be1"],
                       tm=tm, eps=eps)

    # 4) FFN: linear1 + exact GELU (dropout = identity in eval)
    ff = _linear(h, p["w1"], p["b1"], activation="gelu", tm=tm)

    # 5) linear2 + residual + LayerNorm2 (dropout2 = identity in eval)
    return _linear_res_ln(ff, p["w2"], p["b2"], h, p["g2"], p["be2"],
                          tm=tm, eps=eps)


def mlm_task_encoder(src, layer_params, *, nhead, tm=None):
    """src: (seq, batch, ninp) -> (seq, batch, ninp)."""
    S, B, E = src.shape
    # Single relayout to (batch, seq, ninp) so attention batches are contiguous;
    # everything in between is pure-view reshapes.
    x = jnp.transpose(src, (1, 0, 2)).reshape(B * S, E)
    for p in layer_params:
        x = _encoder_layer(x, p, nhead=nhead, S=S, B=B, tm=tm)
    return jnp.transpose(x.reshape(B, S, E), (1, 0, 2))


# ------------------------------ params & ref --------------------------------

def _linear_init(key, fan_in, fan_out, dtype):
    kw, kb = jax.random.split(key)
    bound = 1.0 / float(fan_in) ** 0.5
    w = jax.random.uniform(kw, (fan_in, fan_out), dtype, -bound, bound)
    b = jax.random.uniform(kb, (1, fan_out), dtype, -bound, bound)
    return w, b


def init_encoder_params(key, nlayers, ninp, nhid, dtype=jnp.float32):
    layers = []
    for _ in range(nlayers):
        key, kq, kk, kv, ko, k1, k2 = jax.random.split(key, 7)
        wq, bq = _linear_init(kq, ninp, ninp, dtype)
        wk, bk = _linear_init(kk, ninp, ninp, dtype)
        wv, bv = _linear_init(kv, ninp, ninp, dtype)
        wo, bo = _linear_init(ko, ninp, ninp, dtype)
        w1, b1 = _linear_init(k1, ninp, nhid, dtype)
        w2, b2 = _linear_init(k2, nhid, ninp, dtype)
        layers.append({
            "wqkv": jnp.concatenate([wq, wk, wv], axis=1),
            "bqkv": jnp.concatenate([bq, bk, bv], axis=1),
            "wo": wo, "bo": bo,
            "g1": jnp.ones((1, ninp), dtype), "be1": jnp.zeros((1, ninp), dtype),
            "w1": w1, "b1": b1, "w2": w2, "b2": b2,
            "g2": jnp.ones((1, ninp), dtype), "be2": jnp.zeros((1, ninp), dtype),
        })
    return layers


def _ln_ref(x, g, b, eps=1e-5):
    mean = x.mean(-1, keepdims=True)
    var = ((x - mean) ** 2).mean(-1, keepdims=True)
    return (x - mean) * jax.lax.rsqrt(var + eps) * g + b


def _layer_ref(src, p, nhead, eps=1e-5):
    S, B, E = src.shape
    H = nhead
    Dh = E // H
    qkv = src @ p["wqkv"] + p["bqkv"][0]
    q, k, v = jnp.split(qkv, 3, axis=-1)

    def split_heads(t):
        return jnp.transpose(t.reshape(S, B * H, Dh), (1, 0, 2))

    qh, kh, vh = split_heads(q), split_heads(k), split_heads(v)
    s = jnp.einsum("bqd,bkd->bqk", qh, kh) / float(Dh) ** 0.5
    pw = jax.nn.softmax(s, axis=-1)
    a = jnp.einsum("bqk,bkd->bqd", pw, vh)
    a = jnp.transpose(a, (1, 0, 2)).reshape(S, B, E)
    a = a @ p["wo"] + p["bo"][0]
    h = _ln_ref(src + a, p["g1"][0], p["be1"][0], eps)
    ff = jax.nn.gelu(h @ p["w1"] + p["b1"][0], approximate=False)
    ff = ff @ p["w2"] + p["b2"][0]
    return _ln_ref(h + ff, p["g2"][0], p["be2"][0], eps)


def _reference(src, layer_params, nhead):
    x = src
    for p in layer_params:
        x = _layer_ref(x, p, nhead)
    return x


# ---------------------------------- main ------------------------------------

if __name__ == "__main__":
    ninp, nhead, nhid, nlayers = 32, 4, 64, 2
    seq, batch = 8, 2

    key = jax.random.PRNGKey(0)
    kp, kx = jax.random.split(key)
    params = init_encoder_params(kp, nlayers, ninp, nhid, jnp.float32)
    src = jax.random.normal(kx, (seq, batch, ninp), jnp.float32)

    out = jax.block_until_ready(mlm_task_encoder(src, params, nhead=nhead))

    ref = _reference(src, params, nhead)
    assert out.shape == (seq, batch, ninp)
    assert jnp.allclose(out, ref, atol=2e-3, rtol=2e-3), "mismatch vs reference"

    print("KERNEL_OK")
</pallas_src>

<mosaic_0001>
module attributes {stable_mosaic.version = 11 : i64} {
  func.func @_matmul_bias_kernel(%arg0: i32, %arg1: i32, %arg2: memref<16x32xf32, #tpu.memory_space<vmem>>, %arg3: memref<32x96xf32, #tpu.memory_space<vmem>>, %arg4: memref<1x96xf32, #tpu.memory_space<vmem>>, %arg5: memref<16x96xf32, #tpu.memory_space<vmem>>) attributes {dimension_semantics = [#tpu.dimension_semantics<parallel>, #tpu.dimension_semantics<parallel>], iteration_bounds = array<i64: 1, 1>, scalar_prefetch = 0 : i64, scratch_operands = 0 : i64, tpu.core_type = #tpu.core_type<tc>, window_params = [{transform_indices = @transform_0, window_bounds = array<i64: 16, 32>}, {transform_indices = @transform_1, window_bounds = array<i64: 32, 96>}, {transform_indices = @transform_2, window_bounds = array<i64: 1, 96>}, {transform_indices = @transform_3, window_bounds = array<i64: 16, 96>}]} {
    %c0 = arith.constant 0 : index
    %c0_0 = arith.constant 0 : index
    %0 = vector.load %arg3[%c0, %c0_0] : memref<32x96xf32, #tpu.memory_space<vmem>>, vector<32x96xf32>
    %c0_1 = arith.constant 0 : index
    %c0_2 = arith.constant 0 : index
    %1 = vector.load %arg2[%c0_1, %c0_2] : memref<16x32xf32, #tpu.memory_space<vmem>>, vector<16x32xf32>
    %cst = arith.constant dense<0.000000e+00> : vector<16x96xf32>
    %2 = tpu.matmul %1, %0, %cst {dimension_numbers = #tpu.dot_dimension_numbers<[1], [0], [0], [1], [0, 0, 1, 1], [], []>} : vector<16x32xf32>, vector<32x96xf32>, vector<16x96xf32> -> vector<16x96xf32>
    %c0_3 = arith.constant 0 : index
    %c0_4 = arith.constant 0 : index
    %3 = vector.load %arg4[%c0_3, %c0_4] : memref<1x96xf32, #tpu.memory_space<vmem>>, vector<1x96xf32>
    %4 = vector.broadcast %3 : vector<1x96xf32> to vector<16x96xf32>
    %5 = arith.addf %2, %4 : vector<16x96xf32>
    %c0_5 = arith.constant 0 : index
    %c0_6 = arith.constant 0 : index
    %6 = vector.load %arg5[%c0_5, %c0_6] : memref<16x96xf32, #tpu.memory_space<vmem>>, vector<16x96xf32>
    tpu.vector_store %arg5[%c0_5, %c0_6], %5 {strides = array<i32>} : memref<16x96xf32, #tpu.memory_space<vmem>>, vector<16x96xf32>,
    return
  }
  func.func @transform_0(%arg0: i32, %arg1: i32) -> (i32, i32) {
    %c0_i32 = arith.constant 0 : i32
    %c0_i32_0 = arith.constant 0 : i32
    return %arg1, %c0_i32 : i32, i32
  }
  func.func @transform_1(%arg0: i32, %arg1: i32) -> (i32, i32) {
    %c0_i32 = arith.constant 0 : i32
    %c0_i32_0 = arith.constant 0 : i32
    return %c0_i32, %arg0 : i32, i32
  }
  func.func @transform_2(%arg0: i32, %arg1: i32) -> (i32, i32) {
    %c0_i32 = arith.constant 0 : i32
    %c0_i32_0 = arith.constant 0 : i32
    return %c0_i32, %arg0 : i32, i32
  }
  func.func @transform_3(%arg0: i32, %arg1: i32) -> (i32, i32) {
    %c0_i32 = arith.constant 0 : i32
    return %arg1, %arg0 : i32, i32
  }
}

</mosaic_0001>

<bundles_post_ra>
// kernel: tpu_custom_call.1
= control target key start
LH: loop header
LB: loop body
LE: loop exit
PB: predicated region body
PF: predicated region fallthrough
CT: control target
= control target key end

     0   :  { %8 = vsyncpa [#allocation3], 0  ;;  %s337_s0 = inlined_call_operand.hbm [shape: f32[16,32], index: 0, kind: input, shape index: {}]   ;;  %s338_s1 = inlined_call_operand.hbm [shape: f32[32,96], index: 1, kind: input, shape index: {}]   ;;  %s339_s2 = inlined_call_operand.vmem [shape: f32[1,96], index: 2, kind: input, shape index: {}]   ;;  %s340_s3 = inlined_call_operand.hbm [shape: f32[16,96], index: 3, kind: output, shape index: {}]  }
   0x1   :  { %9 = vsyncpa [#allocation6], 0 }
   0x2   :  { %10 = vsyncpa [#allocation4], 0  ;;  %s264_s12 = smov [#allocation2]   ;;  %s192_s16 = scalar_lea.hbm %s337_s0, 256 }
   0x3   :  { %s16_s13 = sshll.u32 %s264_s12, 4  ;;  %p193_p0 = scmp.ne.s32.totalorder %s337_s0, %s192_s16  ;;  %s17_s13 = int_to_ptr.vmem [resolvable:$true] %s16_s13 }
   0x4   :  { %p196_p1 = scmp.lt.u32.totalorder %s192_s16, %s337_s0 }
   0x6   :  { %p198_p2 = pnand %p196_p1, %p193_p0 }
   0x8   :  { %201 = shalt.err (!%p198_p2)
}
   0x9   :  { %s202_s21 = scalar_lea.vmem %s17_s13, 256  ;;  %p207_p4 = scmp.lt.s32.totalorder %s17_s13, %s17_s13 }
   0xa   :  { %p203_p3 = scmp.ne.s32.totalorder %s17_s13, %s202_s21  ;;  %p208_p5 = scmp.lt.s32.totalorder %s202_s21, %s202_s21 }
   0xc   :  { %p209_p6 = por %p208_p5, %p207_p4 }
   0xe   :  { %p210_p7 = pnand %p209_p6, %p203_p3 }
  0x10   :  { %213 = shalt.err (!%p210_p7)
}
  0x11   :  { %s265_s22 = smov 128   ;;  %s266_s23 = smov 8  }
  0x12   :  { %22 = dma.hbm_to_vmem [thread:$0]  %s337_s0, 256, %s17_s13, [#allocation3], %s265_s22, %s265_s22, %s266_s23  }
  0x13   :  { %s267_s26 = smov [#allocation5]   ;;  %s214_s30 = scalar_lea.hbm %s338_s1, 512 }
  0x14   :  { %s28_s27 = sshll.u32 %s267_s26, 4  ;;  %p215_p8 = scmp.ne.s32.totalorder %s338_s1, %s214_s30  ;;  %s29_s27 = int_to_ptr.vmem [resolvable:$true] %s28_s27 }
  0x15   :  { %p218_p9 = scmp.lt.u32.totalorder %s214_s30, %s338_s1 }
  0x17   :  { %p220_p10 = pnand %p218_p9, %p215_p8 }
  0x19   :  { %223 = shalt.err (!%p220_p10)
}
  0x1a   :  { %s224_s8 = scalar_lea.vmem %s29_s27, 512  ;;  %p229_p12 = scmp.lt.s32.totalorder %s29_s27, %s29_s27 }
  0x1b   :  { %p225_p11 = scmp.ne.s32.totalorder %s29_s27, %s224_s8  ;;  %p230_p13 = scmp.lt.s32.totalorder %s224_s8, %s224_s8 }
  0x1d   :  { %p231_p0 = por %p230_p13, %p229_p12 }
  0x1f   :  { %p232_p1 = pnand %p231_p0, %p225_p11 }
  0x21   :  { %235 = shalt.err (!%p232_p1)
}
  0x22   :  { %34 = dma.hbm_to_vmem [thread:$0]  %s338_s1, 512, %s29_s27, [#allocation6], %s265_s22, %s265_s22, %s266_s23  }
  0x23   :  { %258 = dma.done.wait [#allocation3], 256  }
  0x24   :  { %259 = vsyncadd [#allocation3], 4294967040 }
  0x25   :  { %260 = dma.done.wait [#allocation6], 512  }
  0x26   :  { %261 = vsyncadd [#allocation6], 4294966784  ;;  %vm56_vm0 = vcmask 261120   ;;  %v43_v0 = vld [vmem:[#allocation5] sm:$0xff]  ;;  %v44_v1 = vld [vmem:[#allocation5 + $0x8] sm:$0xff]  ;;  %s268_s11 = smov [#allocation7]  }
  0x27   :  { %v45_v2 = vld [vmem:[#allocation5 + $0x10] sm:$0xff]  ;;  %v179_v3 = vpack.c.bf16 %v44_v1, %v43_v0  ;;  %v46_v4 = vld [vmem:[#allocation5 + $0x18] sm:$0xff]  ;;  %s146_s12 = sshll.u32 %s268_s11, 4  ;;  %vm138_vm1 = vcmask 785408   ;;  %s147_s12 = int_to_ptr.vmem [resolvable:$true] %s146_s12 }
  0x28   :  { %v47_v5 = vld [vmem:[#allocation2] sm:$0xff]  ;;  %v183_v6 = vpack.c.bf16 %v46_v4, %v45_v2  ;;  %v48_v7 = vld [vmem:[#allocation2 + $0x8] sm:$0xff]  ;;  %s236_s13 = scalar_lea.vmem %s147_s12, 256  ;;  %p241_p3 = scmp.lt.s32.totalorder %s147_s12, %s147_s12 }
  0x29   :  { %176 = vmatprep.mubr.msk.f32.mxu0 %vm56_vm0, %v47_v5  ;;  %180 = vmatprep.subr.bf16.mxu0 %v179_v3  ;;  %v159_v8 = vld [vmem:[%s339_s2] ss:$0 sm:$0xff]  ;;  %p237_p2 = scmp.ne.s32.totalorder %s147_s12, %s236_s13  ;;  %p242_p4 = scmp.lt.s32.totalorder %s236_s13, %s236_s13 }
  0x2a   :  { %182 = vmatpush3.bf16.msra.mxu0 %v179_v3 }
  0x2b   :  { %184 = vmatprep.subr.bf16.mxu0 %v183_v6  ;;  %p243_p5 = por %p242_p4, %p241_p3 }
  0x2d   :  { %p244_p6 = pnand %p243_p5, %p237_p2 }
  0x2e   :  { %186 = vmatpush3.bf16.msra.mxu0 %v183_v6 }
  0x31   :  { %177 = vmatmul.mubr.msk.f32.vlgmr.msra.gmra.mrb[0].mxu0 %vm56_vm0, %v48_v7 }
 0x104   :  { %v178_v9 = vpop.f32.mrb[0].mxu0 }
 0x105   :  { %v135_v10 = vadd.f32 %v178_v9, %v159_v8  ;;  %v129_v11 = vpop.f32.mrb[1].mxu0 }
 0x106   :  { %v130_v12 = vadd.f32 %v159_v8, %v129_v11 }
 0x107   :  { %140 = vst.msk [vmem:[#allocation7 + $0x8] sm:$0xff] %vm138_vm1, %v135_v10 }
 0x108   :  { %139 = vst.msk [vmem:[#allocation7] sm:$0xff] %vm138_vm1, %v130_v12 }
 0x109   :  { %247 = shalt.err (!%p244_p6)
}
 0x10a   :  { %s248_s2 = scalar_lea.hbm %s340_s3, 256 }
 0x10b   :  { %p249_p7 = scmp.ne.s32.totalorder %s340_s3, %s248_s2  ;;  %p252_p8 = scmp.lt.u32.totalorder %s248_s2, %s340_s3 }
 0x10d   :  { %p254_p9 = pnand %p252_p8, %p249_p7 }
 0x10f   :  { %257 = shalt.err (!%p254_p9)
}
 0x110   :  { %152 = dma.vmem_to_hbm [thread:$0]  %s147_s12, 256, %s340_s3, [#allocation4], %s265_s22, %s265_s22, %s266_s23  }
 0x111   :  { %262 = dma.done.wait [#allocation4], 256  }
 0x112   :  { %263 = vsyncadd [#allocation4], 4294967040 }
 0x113   :  { %156 = vsyncpa [#allocation3], 1 }
 0x114   :  { %157 = vsyncpa [#allocation6], 1 }
 0x115   :  { %158 = vsyncpa [#allocation4], 1 }

</bundles_post_ra>
